<compile_context>
chip_gen: v7x
topology: tpu7x:2x2x1
jax: 0.10.0
libtpu: 0.0.40
codegen_flags: <defaults>
</compile_context>

<pallas_src>
import functools

import numpy as np
import jax
import jax.numpy as jnp
from jax.experimental import pallas as pl
from jax.experimental.pallas import tpu as pltpu


def _diag_linear_kernel(x_ref, w_ref, o_ref, *, n_vars, p):
    """One batch tile.

    x_ref: (TB, K)       lane dim = full feature width K = n_vars*p (lane-dense)
    w_ref: (1,  K)       compact diagonal weights, flattened row-major
    o_ref: (TB, n_vars)
    """
    x = x_ref[...]
    w = w_ref[...]
    # Lane-dense VPU multiply in the native input dtype (no whole-tile f32 upcast).
    prod = x * w
    # Lag reduction: out[b, i] = sum_lag prod[b, lag*n_vars + i].
    # p-1 narrow static slices + f32 adds; cheap filler under the HBM-bound regime.
    acc = prod[:, 0:n_vars].astype(jnp.float32)
    for lag in range(1, p):
        acc = acc + prod[:, lag * n_vars:(lag + 1) * n_vars].astype(jnp.float32)
    o_ref[...] = acc.astype(o_ref.dtype)


def _vmem_budget_bytes():
    """Per-generation VMEM limit: large tiles on 128 MiB parts, headroom on v7x."""
    phys = 64 << 20  # conservative default (v7x has the smallest VMEM)
    try:
        phys = int(pltpu.get_tpu_info().vmem_capacity_bytes)
    except Exception:
        pass
    if phys >= (128 << 20):   # v5e / v6e (scoped defaults are only 16/32 MiB)
        return 96 << 20
    return 40 << 20           # v7x: 64 MiB physical -> leave Mosaic scratch headroom


def diagonal_linear(x, weight, mask=None, *, block_batch=None):
    """x: (batch, n_vars*p); weight: (n_vars, n_vars*p) -> (batch, n_vars).

    NOTE: `mask` is assumed to be the canonical DiagonalLinear mask
    (create_mask(n_vars, p)); the kernel reads only the diagonal entries of
    `weight`, which is exactly what that mask selects, so `mask` is unused.
    """
    del mask
    batch, k = x.shape
    n_vars, k2 = weight.shape
    assert k == k2, "feature dim mismatch"
    assert k % n_vars == 0, "feature dim must be n_vars * p"
    p = k // n_vars

    # Compact diagonal weights, no dense mask multiply:
    #   w_flat[0, lag*n_vars + i] = weight[i, lag*n_vars + i]
    w_diag = jnp.diagonal(weight.reshape(n_vars, p, n_vars), axis1=0, axis2=2)  # (p, n_vars)
    w_flat = w_diag.reshape(1, k).astype(x.dtype)

    itemsize = x.dtype.itemsize
    vmem_budget = _vmem_budget_bytes()

    # Size the batch tile by bytes: per-step VMEM ~ 2*x_tile + 2*out_tile + w.
    max_tile_bytes = max((vmem_budget - (4 << 20)) // 3, 512 << 10)
    target_tile_bytes = min(8 << 20, max_tile_bytes)
    if block_batch is not None:
        tb = int(block_batch)
    else:
        tb = max(8, (target_tile_bytes // (k * itemsize)) // 8 * 8)
    if tb >= batch:
        tb = batch            # full-extent block: always a legal block shape
    elif tb % 8 != 0:
        tb = max(8, (tb // 8) * 8)

    grid = (pl.cdiv(batch, tb),)   # ragged tail handled by Pallas (no jnp.pad)

    cost = pl.CostEstimate(
        flops=2 * batch * k,
        transcendentals=0,
        bytes_accessed=batch * k * itemsize + batch * n_vars * itemsize + k * itemsize,
    )

    kernel = functools.partial(_diag_linear_kernel, n_vars=n_vars, p=p)

    return pl.pallas_call(
        kernel,
        out_shape=jax.ShapeDtypeStruct((batch, n_vars), x.dtype),
        grid_spec=pl.GridSpec(
            grid=grid,
            in_specs=[
                # x tile marches over the batch axis; lane dim = full feature width.
                pl.BlockSpec((tb, k), lambda i: (i, 0)),
                # Tiny compact weight stays resident across all grid steps.
                pl.BlockSpec((1, k), lambda i: (0, 0)),
            ],
            out_specs=pl.BlockSpec((tb, n_vars), lambda i: (i, 0)),
        ),
        compiler_params=pltpu.CompilerParams(
            dimension_semantics=(pltpu.PARALLEL,),
            vmem_limit_bytes=vmem_budget,
        ),
        cost_estimate=cost,
    )(x, w_flat)


def create_mask(n_vars, p):
    mask = np.zeros((n_vars, n_vars * p), dtype=np.float32)
    for i in range(n_vars):
        for lag in range(p):
            mask[i, lag * n_vars + i] = 1.0
    return jnp.asarray(mask)


if __name__ == "__main__":
    n_vars = 4
    p = 8
    batch = 16

    key = jax.random.PRNGKey(0)
    kx, kw = jax.random.split(key)

    # Deterministic synthetic parameters (module inits weight to zeros; we use
    # a deterministic random init so the kernel output is non-trivial).
    x = jax.random.normal(kx, (batch, n_vars * p), dtype=jnp.float32)
    weight = jax.random.normal(kw, (n_vars, n_vars * p), dtype=jnp.float32)
    mask = create_mask(n_vars, p)

    # Pure-JAX reference (exactly the module math).
    ref = np.asarray(x @ (weight * mask).T)

    # Default path (auto byte-sized tile; single block at this small batch).
    out = jax.block_until_ready(diagonal_linear(x, weight, mask))
    np.testing.assert_allclose(np.asarray(out), ref, rtol=1e-5, atol=1e-5)

    # Multi-step grid path (exercises the pipelined batch tiling).
    out2 = jax.block_until_ready(diagonal_linear(x, weight, mask, block_batch=8))
    np.testing.assert_allclose(np.asarray(out2), ref, rtol=1e-5, atol=1e-5)

    print("KERNEL_OK")
</pallas_src>

<mosaic_0001>
module attributes {stable_mosaic.version = 11 : i64} {
  func.func @_diag_linear_kernel(%arg0: i32, %arg1: memref<16x32xf32, #tpu.memory_space<vmem>>, %arg2: memref<1x32xf32, #tpu.memory_space<vmem>>, %arg3: memref<16x4xf32, #tpu.memory_space<vmem>>) attributes {dimension_semantics = [#tpu.dimension_semantics<parallel>], iteration_bounds = array<i64: 1>, scalar_prefetch = 0 : i64, scratch_operands = 0 : i64, tpu.core_type = #tpu.core_type<tc>, window_params = [{transform_indices = @transform_0, window_bounds = array<i64: 16, 32>}, {pipeline_mode = #tpu.pipeline_mode<synchronous>, transform_indices = @transform_1, window_bounds = array<i64: 1, 32>}, {transform_indices = @transform_2, window_bounds = array<i64: 16, 4>}]} {
    %c0 = arith.constant 0 : index
    %c0_0 = arith.constant 0 : index
    %0 = vector.load %arg1[%c0, %c0_0] : memref<16x32xf32, #tpu.memory_space<vmem>>, vector<16x32xf32>
    %c0_1 = arith.constant 0 : index
    %c0_2 = arith.constant 0 : index
    %1 = vector.load %arg2[%c0_1, %c0_2] : memref<1x32xf32, #tpu.memory_space<vmem>>, vector<1x32xf32>
    %2 = vector.broadcast %1 : vector<1x32xf32> to vector<16x32xf32>
    %3 = arith.mulf %0, %2 : vector<16x32xf32>
    %4 = vector.extract_strided_slice %3 {offsets = [0, 0], sizes = [16, 4], strides = [1, 1]} : vector<16x32xf32> to vector<16x4xf32>
    %5 = vector.extract_strided_slice %3 {offsets = [0, 4], sizes = [16, 4], strides = [1, 1]} : vector<16x32xf32> to vector<16x4xf32>
    %6 = arith.addf %4, %5 : vector<16x4xf32>
    %7 = vector.extract_strided_slice %3 {offsets = [0, 8], sizes = [16, 4], strides = [1, 1]} : vector<16x32xf32> to vector<16x4xf32>
    %8 = arith.addf %6, %7 : vector<16x4xf32>
    %9 = vector.extract_strided_slice %3 {offsets = [0, 12], sizes = [16, 4], strides = [1, 1]} : vector<16x32xf32> to vector<16x4xf32>
    %10 = arith.addf %8, %9 : vector<16x4xf32>
    %11 = vector.extract_strided_slice %3 {offsets = [0, 16], sizes = [16, 4], strides = [1, 1]} : vector<16x32xf32> to vector<16x4xf32>
    %12 = arith.addf %10, %11 : vector<16x4xf32>
    %13 = vector.extract_strided_slice %3 {offsets = [0, 20], sizes = [16, 4], strides = [1, 1]} : vector<16x32xf32> to vector<16x4xf32>
    %14 = arith.addf %12, %13 : vector<16x4xf32>
    %15 = vector.extract_strided_slice %3 {offsets = [0, 24], sizes = [16, 4], strides = [1, 1]} : vector<16x32xf32> to vector<16x4xf32>
    %16 = arith.addf %14, %15 : vector<16x4xf32>
    %17 = vector.extract_strided_slice %3 {offsets = [0, 28], sizes = [16, 4], strides = [1, 1]} : vector<16x32xf32> to vector<16x4xf32>
    %18 = arith.addf %16, %17 : vector<16x4xf32>
    %c0_3 = arith.constant 0 : index
    %c0_4 = arith.constant 0 : index
    %19 = vector.load %arg3[%c0_3, %c0_4] : memref<16x4xf32, #tpu.memory_space<vmem>>, vector<16x4xf32>
    tpu.vector_store %arg3[%c0_3, %c0_4], %18 {strides = array<i32>} : memref<16x4xf32, #tpu.memory_space<vmem>>, vector<16x4xf32>,
    return
  }
  func.func @transform_0(%arg0: i32) -> (i32, i32) {
    %c0_i32 = arith.constant 0 : i32
    %c0_i32_0 = arith.constant 0 : i32
    return %arg0, %c0_i32 : i32, i32
  }
  func.func @transform_1(%arg0: i32) -> (i32, i32) {
    %c0_i32 = arith.constant 0 : i32
    %c0_i32_0 = arith.constant 0 : i32
    %c0_i32_1 = arith.constant 0 : i32
    return %c0_i32, %c0_i32_0 : i32, i32
  }
  func.func @transform_2(%arg0: i32) -> (i32, i32) {
    %c0_i32 = arith.constant 0 : i32
    %c0_i32_0 = arith.constant 0 : i32
    return %arg0, %c0_i32 : i32, i32
  }
}

</mosaic_0001>

<bundles_post_ra>
// kernel: tpu_custom_call.1
= control target key start
LH: loop header
LB: loop body
LE: loop exit
PB: predicated region body
PF: predicated region fallthrough
CT: control target
= control target key end

     0   :  { %7 = vsyncpa [#allocation3], 0  ;;  %s137_s9 = smov [#allocation2]   ;;  %s183_s0 = inlined_call_operand.hbm [shape: f32[16,32], index: 0, kind: input, shape index: {}]   ;;  %s184_s1 = inlined_call_operand.vmem [shape: f32[1,32], index: 1, kind: input, shape index: {}]   ;;  %s185_s2 = inlined_call_operand.vmem [shape: f32[16,4], index: 2, kind: output, shape index: {}]  }
   0x1   :  { %s13_s10 = sshll.u32 %s137_s9, 4  ;;  %s113_s13 = scalar_lea.hbm %s183_s0, 256  ;;  %s14_s10 = int_to_ptr.vmem [resolvable:$true] %s13_s10 }
   0x2   :  { %p114_p0 = scmp.ne.s32.totalorder %s183_s0, %s113_s13  ;;  %p117_p1 = scmp.lt.u32.totalorder %s113_s13, %s183_s0 }
   0x4   :  { %p119_p2 = pnand %p117_p1, %p114_p0 }
   0x6   :  { %122 = shalt.err (!%p119_p2)
}
   0x7   :  { %s123_s18 = scalar_lea.vmem %s14_s10, 256  ;;  %p128_p4 = scmp.lt.s32.totalorder %s14_s10, %s14_s10 }
   0x8   :  { %p124_p3 = scmp.ne.s32.totalorder %s14_s10, %s123_s18  ;;  %p129_p5 = scmp.lt.s32.totalorder %s123_s18, %s123_s18 }
   0xa   :  { %p130_p6 = por %p129_p5, %p128_p4 }
   0xc   :  { %p131_p7 = pnand %p130_p6, %p124_p3 }
   0xe   :  { %134 = shalt.err (!%p131_p7)
}
   0xf   :  { %s138_s19 = smov 128   ;;  %s139_s20 = smov 8  }
  0x10   :  { %19 = dma.hbm_to_vmem [thread:$0]  %s183_s0, 256, %s14_s10, [#allocation3], %s138_s19, %s138_s19, %s139_s20  }
  0x11   :  { %135 = dma.done.wait [#allocation3], 256  }
  0x12   :  { %136 = vsyncadd [#allocation3], 4294967040  ;;  %v25_v0 = vld [vmem:[#allocation2] sm:$0xff]  ;;  %v26_v2 = vld [vmem:[#allocation2 + $0x8] sm:$0xff]  ;;  %s140_s25 = smov 120   ;;  %s141_s26 = smov 124  }
  0x13   :  { %v102_v1 = vld [vmem:[%s184_s1] ss:$0 sm:$0xff]  ;;  %s142_s27 = smov 116   ;;  %s143_s0 = smov 112   ;;  %vm94_vm0 = vcmask 31744  }
  0x14   :  { %v34_v3 = vmul.f32 %v102_v1, %v25_v0  ;;  %v35_v4 = vmul.f32 %v102_v1, %v26_v2  ;;  %s144_s28 = smov 108   ;;  %s145_s29 = smov 104  }
  0x15   :  { %s146_s1 = smov 100  }
  0x16   :  { %46 = vrot.lane.b32.xlu1 %v34_v3, %s140_s25  ;;  %38 = vrot.lane.b32.xlu0 %v34_v3, %s141_s26 }
  0x1a   :  { %48 = vrot.lane.b32.xlu1 %v35_v4, %s140_s25  ;;  %40 = vrot.lane.b32.xlu0 %v35_v4, %s141_s26 }
  0x1e   :  { %56 = vrot.lane.b32.xlu1 %v35_v4, %s142_s27  ;;  %54 = vrot.lane.b32.xlu0 %v34_v3, %s142_s27 }
  0x22   :  { %64 = vrot.lane.b32.xlu1 %v35_v4, %s143_s0  ;;  %62 = vrot.lane.b32.xlu0 %v34_v3, %s143_s0 }
  0x26   :  { %72 = vrot.lane.b32.xlu1 %v35_v4, %s144_s28  ;;  %70 = vrot.lane.b32.xlu0 %v34_v3, %s144_s28 }
  0x2a   :  { %80 = vrot.lane.b32.xlu1 %v35_v4, %s145_s29  ;;  %78 = vrot.lane.b32.xlu0 %v34_v3, %s145_s29 }
  0x2e   :  { %88 = vrot.lane.b32.xlu1 %v35_v4, %s146_s1  ;;  %86 = vrot.lane.b32.xlu0 %v34_v3, %s146_s1 }
  0x88   :  { %v47_v5 = vpop.permute.xlu1 %46  ;;  %v39_v6 = vpop.permute.xlu0 %38 }
  0x89   :  { %v44_v12 = vadd.f32 %v39_v6, %v34_v3 }
  0x8b   :  { %v52_v16 = vadd.f32 %v47_v5, %v44_v12 }
  0x8c   :  { %v49_v7 = vpop.permute.xlu1 %48  ;;  %v41_v8 = vpop.permute.xlu0 %40 }
  0x8d   :  { %v45_v11 = vadd.f32 %v41_v8, %v35_v4 }
  0x8f   :  { %v53_v15 = vadd.f32 %v49_v7, %v45_v11 }
  0x90   :  { %v57_v9 = vpop.permute.xlu1 %56  ;;  %v55_v10 = vpop.permute.xlu0 %54 }
  0x91   :  { %v61_v19 = vadd.f32 %v57_v9, %v53_v15  ;;  %v60_v20 = vadd.f32 %v55_v10, %v52_v16 }
  0x94   :  { %v65_v13 = vpop.permute.xlu1 %64  ;;  %v63_v14 = vpop.permute.xlu0 %62 }
  0x95   :  { %v69_v21 = vadd.f32 %v65_v13, %v61_v19  ;;  %v68_v22 = vadd.f32 %v63_v14, %v60_v20 }
  0x98   :  { %v73_v17 = vpop.permute.xlu1 %72  ;;  %v71_v18 = vpop.permute.xlu0 %70 }
  0x99   :  { %v77_v25 = vadd.f32 %v73_v17, %v69_v21  ;;  %v76_v26 = vadd.f32 %v71_v18, %v68_v22 }
  0x9c   :  { %v81_v23 = vpop.permute.xlu1 %80  ;;  %v79_v24 = vpop.permute.xlu0 %78 }
  0x9d   :  { %v85_v27 = vadd.f32 %v81_v23, %v77_v25  ;;  %v84_v28 = vadd.f32 %v79_v24, %v76_v26 }
  0xa0   :  { %v89_v29 = vpop.permute.xlu1 %88  ;;  %v87_v30 = vpop.permute.xlu0 %86 }
  0xa1   :  { %v93_v31 = vadd.f32 %v89_v29, %v85_v27  ;;  %v92_v32 = vadd.f32 %v87_v30, %v84_v28 }
  0xa3   :  { %96 = vst.msk [vmem:[%s185_s2 + $0x8] sm:$0xff] %vm94_vm0, %v93_v31  ;;  %95 = vst.msk [vmem:[%s185_s2] sm:$0xff] %vm94_vm0, %v92_v32 }
  0xa4   :  { %101 = vsyncpa [#allocation3], 1 }

</bundles_post_ra>
